<compile_context>
chip_gen: v6e
topology: v6e:2x2x1
jax: 0.10.0
libtpu: 0.0.40
codegen_flags: <defaults>
</compile_context>

<pallas_src>
import functools

import jax
import jax.numpy as jnp
from jax.experimental import pallas as pl
from jax.experimental.pallas import tpu as pltpu


# ---- options (deterministic, in-script; mirrors options.loss.sdf.*) ----------
SDF_THRESHOLD = 0.01
SDF_NEAR_SURFACE_WEIGHT = 4.0
SDF_SCALE = 10.0
SDF_COEFFICIENT = 2.0

LANES = 128
MAX_TILE_ROWS = 1024   # 1024x128 f32 tile = 512 KiB/input; x2 inputs x2 buffers = 2 MiB VMEM
NUM_CORES = 2          # leading "parallel" grid axis -> both TCs on v7x; no-op on v5e/v6e


def _round_up(x, m):
    return ((x + m - 1) // m) * m


def _sdf_loss_kernel(t_ref, o_ref, wl1_ref, rl1_ref, acc_ref,
                     *, threshold, near_w, scale):
    i = pl.program_id(1)  # inner reduction axis ("arbitrary")

    @pl.when(i == 0)
    def _():
        wl1_ref[...] = jnp.zeros_like(wl1_ref)
        rl1_ref[...] = jnp.zeros_like(rl1_ref)
        acc_ref[...] = jnp.zeros_like(acc_ref)

    # cast tile-wise (inputs may be bf16 etc.; no wrapper-side HBM f32 copy)
    t = t_ref[...].astype(jnp.float32)
    o = o_ref[...].astype(jnp.float32)

    # weight_mask = (t < thr) * near_w + (t >= thr) * 1.0
    wm = jnp.where(t < jnp.float32(threshold), jnp.float32(near_w), jnp.float32(1.0))
    # shared difference; realvalue L1 is sum(d)/scale, finalized in the wrapper
    d = jnp.abs(t * jnp.float32(scale) - o)
    sign_eq = ((t > 0.0) == (o > 0.0)).astype(jnp.float32)

    def fold(x):
        # (tile_rows, 128) -> (8, 128): elementwise vreg adds only (VPU, no XLU)
        return jnp.sum(x.reshape(-1, 8, LANES), axis=0)

    wl1_ref[...] += fold(d * wm)
    rl1_ref[...] += fold(d)
    acc_ref[...] += fold(sign_eq)


def sdf_loss(pred_dict, input_batch):
    """Pallas implementation of SDFLoss.forward (any matching input shape)."""
    targets = input_batch['sdf_value']
    outputs = pred_dict['pred_sdf']
    assert targets.shape == outputs.shape

    n = targets.size
    rows_needed = pl.cdiv(n, LANES)
    tile_rows = min(MAX_TILE_ROWS, _round_up(pl.cdiv(rows_needed, NUM_CORES), 8))
    tiles_per_core = pl.cdiv(rows_needed, NUM_CORES * tile_rows)
    rows_padded = NUM_CORES * tiles_per_core * tile_rows
    n_padded = rows_padded * LANES
    pad = n_padded - n

    t_flat = targets.reshape(-1)
    o_flat = outputs.reshape(-1)
    if pad:
        # zero padding: |0*scale - 0| = 0, so wl1/rl1 sums are unaffected; each
        # padded element contributes exactly 1.0 to the sign-agreement sum,
        # which is subtracted back out below.
        t_flat = jnp.pad(t_flat, (0, pad))
        o_flat = jnp.pad(o_flat, (0, pad))
    t2 = t_flat.reshape(rows_padded, LANES)
    o2 = o_flat.reshape(rows_padded, LANES)

    kernel = functools.partial(
        _sdf_loss_kernel,
        threshold=SDF_THRESHOLD,
        near_w=SDF_NEAR_SURFACE_WEIGHT,
        scale=SDF_SCALE,
    )

    part_shape = jax.ShapeDtypeStruct((NUM_CORES, 8, LANES), jnp.float32)
    part_spec = pl.BlockSpec((None, 8, LANES), lambda c, i: (c, 0, 0))
    in_spec = pl.BlockSpec((tile_rows, LANES),
                           lambda c, i: (c * tiles_per_core + i, 0))

    wl1_p, rl1_p, acc_p = pl.pallas_call(
        kernel,
        out_shape=(part_shape, part_shape, part_shape),
        grid_spec=pltpu.PrefetchScalarGridSpec(
            num_scalar_prefetch=0,
            grid=(NUM_CORES, tiles_per_core),
            in_specs=[in_spec, in_spec],
            out_specs=(part_spec, part_spec, part_spec),
        ),
        compiler_params=pltpu.CompilerParams(
            dimension_semantics=("parallel", "arbitrary")),
    )(t2, o2)

    # final cross-lane reductions on tiny (2,8,128) slabs done in plain JAX
    wl1_sum = jnp.sum(wl1_p)
    rl1_sum = jnp.sum(rl1_p)
    acc_sum = jnp.sum(acc_p) - jnp.float32(pad)   # remove padded sign matches

    inv_n = jnp.float32(1.0 / n)
    sdf_loss_v = wl1_sum * inv_n * jnp.float32(SDF_COEFFICIENT)
    sdf_loss_realvalue = rl1_sum * inv_n * jnp.float32(1.0 / SDF_SCALE)
    accuracy = acc_sum * inv_n

    loss = sdf_loss_v
    return loss, {
        'loss': loss,
        'sdf_loss': sdf_loss_v,
        'sdf_loss_realvalue': sdf_loss_realvalue,
        'accuracy': accuracy,
    }


def _reference(pred_dict, input_batch):
    # pure-JAX reference (mirrors the PyTorch forward)
    t = input_batch['sdf_value'].astype(jnp.float32)
    o = pred_dict['pred_sdf'].astype(jnp.float32)
    wm = (t < SDF_THRESHOLD).astype(jnp.float32) * SDF_NEAR_SURFACE_WEIGHT + \
         (t >= SDF_THRESHOLD).astype(jnp.float32)
    sdf_loss_v = jnp.mean(jnp.abs(t * SDF_SCALE - o) * wm) * SDF_COEFFICIENT
    sdf_loss_realvalue = jnp.mean(jnp.abs(t - o / SDF_SCALE))
    accuracy = jnp.mean(((t > 0.0) == (o > 0.0)).astype(jnp.float32))
    return sdf_loss_v, sdf_loss_realvalue, accuracy


if __name__ == "__main__":
    key = jax.random.PRNGKey(0)
    k1, k2, k3, k4 = jax.random.split(key, 4)

    # case 1: batch=2, num_sdf_points=2048 (multiple of 128 -> no padding path)
    B, P = 2, 2048
    sdf_value = jax.random.normal(k1, (B, P), dtype=jnp.float32) * 0.05
    pred_sdf = jax.random.normal(k2, (B, P), dtype=jnp.float32) * 0.5
    input_batch = {'sdf_value': sdf_value}
    pred_dict = {'pred_sdf': pred_sdf}

    loss, out = sdf_loss(pred_dict, input_batch)
    jax.block_until_ready(loss)
    jax.block_until_ready(out)

    ref_loss, ref_real, ref_acc = _reference(pred_dict, input_batch)
    assert jnp.allclose(out['sdf_loss'], ref_loss, rtol=1e-5, atol=1e-6)
    assert jnp.allclose(out['sdf_loss_realvalue'], ref_real, rtol=1e-5, atol=1e-6)
    assert jnp.allclose(out['accuracy'], ref_acc, rtol=1e-5, atol=1e-6)

    # case 2: ragged size (exercises zero-pad + accuracy correction path)
    B2, P2 = 3, 1000
    sdf_value2 = jax.random.normal(k3, (B2, P2), dtype=jnp.float32) * 0.05
    pred_sdf2 = jax.random.normal(k4, (B2, P2), dtype=jnp.float32) * 0.5
    input_batch2 = {'sdf_value': sdf_value2}
    pred_dict2 = {'pred_sdf': pred_sdf2}

    loss2, out2 = sdf_loss(pred_dict2, input_batch2)
    jax.block_until_ready(loss2)

    ref_loss2, ref_real2, ref_acc2 = _reference(pred_dict2, input_batch2)
    assert jnp.allclose(out2['sdf_loss'], ref_loss2, rtol=1e-5, atol=1e-6)
    assert jnp.allclose(out2['sdf_loss_realvalue'], ref_real2, rtol=1e-5, atol=1e-6)
    assert jnp.allclose(out2['accuracy'], ref_acc2, rtol=1e-5, atol=1e-6)

    print("KERNEL_OK")
</pallas_src>

<mosaic_0001>
module attributes {stable_mosaic.version = 11 : i64} {
  func.func @_sdf_loss_kernel(%arg0: i32, %arg1: i32, %arg2: memref<16x128xf32, #tpu.memory_space<vmem>>, %arg3: memref<16x128xf32, #tpu.memory_space<vmem>>, %arg4: memref<1x8x128xf32, #tpu.memory_space<vmem>>, %arg5: memref<1x8x128xf32, #tpu.memory_space<vmem>>, %arg6: memref<1x8x128xf32, #tpu.memory_space<vmem>>) attributes {dimension_semantics = [#tpu.dimension_semantics<parallel>, #tpu.dimension_semantics<arbitrary>], iteration_bounds = array<i64: 2, 1>, scalar_prefetch = 0 : i64, scratch_operands = 0 : i64, tpu.core_type = #tpu.core_type<tc>, window_params = [{transform_indices = @transform_0, window_bounds = array<i64: 16, 128>}, {transform_indices = @transform_1, window_bounds = array<i64: 16, 128>}, {transform_indices = @transform_2, window_bounds = array<i64: 1, 8, 128>}, {transform_indices = @transform_3, window_bounds = array<i64: 1, 8, 128>}, {transform_indices = @transform_4, window_bounds = array<i64: 1, 8, 128>}]} {
    %c0_i32 = arith.constant 0 : i32
    %0 = arith.cmpi eq, %arg1, %c0_i32 : i32
    %1 = arith.extui %0 : i1 to i32
    %c0_i32_0 = arith.constant 0 : i32
    %2 = arith.cmpi ne, %1, %c0_i32_0 : i32
    scf.if %2 {
      %cst_31 = arith.constant 0.000000e+00 : f32
      %47 = vector.broadcast %cst_31 : f32 to vector<8x128xf32>
      %c0_32 = arith.constant 0 : index
      %c0_33 = arith.constant 0 : index
      %c0_34 = arith.constant 0 : index
      %48 = vector.load %arg4[%c0_32, %c0_33, %c0_34] : memref<1x8x128xf32, #tpu.memory_space<vmem>>, vector<1x8x128xf32>
      %49 = vector.shape_cast %48 : vector<1x8x128xf32> to vector<8x128xf32>
      %50 = vector.shape_cast %47 : vector<8x128xf32> to vector<1x8x128xf32>
      tpu.vector_store %arg4[%c0_32, %c0_33, %c0_34], %50 {strides = array<i32>} : memref<1x8x128xf32, #tpu.memory_space<vmem>>, vector<1x8x128xf32>,
      %cst_35 = arith.constant 0.000000e+00 : f32
      %51 = vector.broadcast %cst_35 : f32 to vector<8x128xf32>
      %c0_36 = arith.constant 0 : index
      %c0_37 = arith.constant 0 : index
      %c0_38 = arith.constant 0 : index
      %52 = vector.load %arg5[%c0_36, %c0_37, %c0_38] : memref<1x8x128xf32, #tpu.memory_space<vmem>>, vector<1x8x128xf32>
      %53 = vector.shape_cast %52 : vector<1x8x128xf32> to vector<8x128xf32>
      %54 = vector.shape_cast %51 : vector<8x128xf32> to vector<1x8x128xf32>
      tpu.vector_store %arg5[%c0_36, %c0_37, %c0_38], %54 {strides = array<i32>} : memref<1x8x128xf32, #tpu.memory_space<vmem>>, vector<1x8x128xf32>,
      %cst_39 = arith.constant 0.000000e+00 : f32
      %55 = vector.broadcast %cst_39 : f32 to vector<8x128xf32>
      %c0_40 = arith.constant 0 : index
      %c0_41 = arith.constant 0 : index
      %c0_42 = arith.constant 0 : index
      %56 = vector.load %arg6[%c0_40, %c0_41, %c0_42] : memref<1x8x128xf32, #tpu.memory_space<vmem>>, vector<1x8x128xf32>
      %57 = vector.shape_cast %56 : vector<1x8x128xf32> to vector<8x128xf32>
      %58 = vector.shape_cast %55 : vector<8x128xf32> to vector<1x8x128xf32>
      tpu.vector_store %arg6[%c0_40, %c0_41, %c0_42], %58 {strides = array<i32>} : memref<1x8x128xf32, #tpu.memory_space<vmem>>, vector<1x8x128xf32>,
    } else {
    }
    %c0 = arith.constant 0 : index
    %c0_1 = arith.constant 0 : index
    %3 = vector.load %arg2[%c0, %c0_1] : memref<16x128xf32, #tpu.memory_space<vmem>>, vector<16x128xf32>
    %c0_2 = arith.constant 0 : index
    %c0_3 = arith.constant 0 : index
    %4 = vector.load %arg3[%c0_2, %c0_3] : memref<16x128xf32, #tpu.memory_space<vmem>>, vector<16x128xf32>
    %cst = arith.constant 0.00999999977 : f32
    %5 = vector.broadcast %cst : f32 to vector<16x128xf32>
    %6 = arith.cmpf olt, %3, %5 : vector<16x128xf32>
    %cst_4 = arith.constant 4.000000e+00 : f32
    %cst_5 = arith.constant 1.000000e+00 : f32
    %7 = vector.broadcast %cst_4 : f32 to vector<16x128xf32>
    %8 = vector.broadcast %cst_5 : f32 to vector<16x128xf32>
    %9 = arith.select %6, %7, %8 : vector<16x128xi1>, vector<16x128xf32>
    %cst_6 = arith.constant 1.000000e+01 : f32
    %10 = vector.broadcast %cst_6 : f32 to vector<16x128xf32>
    %11 = arith.mulf %3, %10 : vector<16x128xf32>
    %12 = arith.subf %11, %4 : vector<16x128xf32>
    %13 = math.absf %12 : vector<16x128xf32>
    %cst_7 = arith.constant 0.000000e+00 : f32
    %14 = vector.broadcast %cst_7 : f32 to vector<16x128xf32>
    %15 = arith.cmpf ogt, %3, %14 : vector<16x128xf32>
    %cst_8 = arith.constant 0.000000e+00 : f32
    %16 = vector.broadcast %cst_8 : f32 to vector<16x128xf32>
    %17 = arith.cmpf ogt, %4, %16 : vector<16x128xf32>
    %18 = arith.xori %15, %17 : vector<16x128xi1>
    %cst_9 = arith.constant dense<true> : vector<16x128xi1>
    %19 = arith.xori %18, %cst_9 : vector<16x128xi1>
    %20 = arith.extui %19 : vector<16x128xi1> to vector<16x128xi32>
    %21 = arith.sitofp %20 : vector<16x128xi32> to vector<16x128xf32>
    %c0_10 = arith.constant 0 : index
    %c0_11 = arith.constant 0 : index
    %c0_12 = arith.constant 0 : index
    %22 = vector.load %arg4[%c0_10, %c0_11, %c0_12] : memref<1x8x128xf32, #tpu.memory_space<vmem>>, vector<1x8x128xf32>
    %23 = vector.shape_cast %22 : vector<1x8x128xf32> to vector<8x128xf32>
    %24 = arith.mulf %13, %9 : vector<16x128xf32>
    %25 = vector.shape_cast %24 : vector<16x128xf32> to vector<2x8x128xf32>
    %cst_13 = arith.constant dense<0.000000e+00> : vector<8x128xf32>
    %26 = vector.multi_reduction <add>, %25, %cst_13 [0] : vector<2x8x128xf32> to vector<8x128xf32>
    %27 = arith.addf %23, %26 : vector<8x128xf32>
    %c0_14 = arith.constant 0 : index
    %c0_15 = arith.constant 0 : index
    %c0_16 = arith.constant 0 : index
    %28 = vector.load %arg4[%c0_14, %c0_15, %c0_16] : memref<1x8x128xf32, #tpu.memory_space<vmem>>, vector<1x8x128xf32>
    %29 = vector.shape_cast %28 : vector<1x8x128xf32> to vector<8x128xf32>
    %30 = vector.shape_cast %27 : vector<8x128xf32> to vector<1x8x128xf32>
    tpu.vector_store %arg4[%c0_14, %c0_15, %c0_16], %30 {strides = array<i32>} : memref<1x8x128xf32, #tpu.memory_space<vmem>>, vector<1x8x128xf32>,
    %c0_17 = arith.constant 0 : index
    %c0_18 = arith.constant 0 : index
    %c0_19 = arith.constant 0 : index
    %31 = vector.load %arg5[%c0_17, %c0_18, %c0_19] : memref<1x8x128xf32, #tpu.memory_space<vmem>>, vector<1x8x128xf32>
    %32 = vector.shape_cast %31 : vector<1x8x128xf32> to vector<8x128xf32>
    %33 = vector.shape_cast %13 : vector<16x128xf32> to vector<2x8x128xf32>
    %cst_20 = arith.constant dense<0.000000e+00> : vector<8x128xf32>
    %34 = vector.multi_reduction <add>, %33, %cst_20 [0] : vector<2x8x128xf32> to vector<8x128xf32>
    %35 = arith.addf %32, %34 : vector<8x128xf32>
    %c0_21 = arith.constant 0 : index
    %c0_22 = arith.constant 0 : index
    %c0_23 = arith.constant 0 : index
    %36 = vector.load %arg5[%c0_21, %c0_22, %c0_23] : memref<1x8x128xf32, #tpu.memory_space<vmem>>, vector<1x8x128xf32>
    %37 = vector.shape_cast %36 : vector<1x8x128xf32> to vector<8x128xf32>
    %38 = vector.shape_cast %35 : vector<8x128xf32> to vector<1x8x128xf32>
    tpu.vector_store %arg5[%c0_21, %c0_22, %c0_23], %38 {strides = array<i32>} : memref<1x8x128xf32, #tpu.memory_space<vmem>>, vector<1x8x128xf32>,
    %c0_24 = arith.constant 0 : index
    %c0_25 = arith.constant 0 : index
    %c0_26 = arith.constant 0 : index
    %39 = vector.load %arg6[%c0_24, %c0_25, %c0_26] : memref<1x8x128xf32, #tpu.memory_space<vmem>>, vector<1x8x128xf32>
    %40 = vector.shape_cast %39 : vector<1x8x128xf32> to vector<8x128xf32>
    %41 = vector.shape_cast %21 : vector<16x128xf32> to vector<2x8x128xf32>
    %cst_27 = arith.constant dense<0.000000e+00> : vector<8x128xf32>
    %42 = vector.multi_reduction <add>, %41, %cst_27 [0] : vector<2x8x128xf32> to vector<8x128xf32>
    %43 = arith.addf %40, %42 : vector<8x128xf32>
    %c0_28 = arith.constant 0 : index
    %c0_29 = arith.constant 0 : index
    %c0_30 = arith.constant 0 : index
    %44 = vector.load %arg6[%c0_28, %c0_29, %c0_30] : memref<1x8x128xf32, #tpu.memory_space<vmem>>, vector<1x8x128xf32>
    %45 = vector.shape_cast %44 : vector<1x8x128xf32> to vector<8x128xf32>
    %46 = vector.shape_cast %43 : vector<8x128xf32> to vector<1x8x128xf32>
    tpu.vector_store %arg6[%c0_28, %c0_29, %c0_30], %46 {strides = array<i32>} : memref<1x8x128xf32, #tpu.memory_space<vmem>>, vector<1x8x128xf32>,
    return
  }
  func.func @transform_0(%arg0: i32, %arg1: i32) -> (i32, i32) {
    %c1_i32 = arith.constant 1 : i32
    %0 = arith.muli %arg0, %c1_i32 : i32
    %1 = arith.addi %0, %arg1 : i32
    %c0_i32 = arith.constant 0 : i32
    %c0_i32_0 = arith.constant 0 : i32
    return %1, %c0_i32 : i32, i32
  }
  func.func @transform_1(%arg0: i32, %arg1: i32) -> (i32, i32) {
    %c1_i32 = arith.constant 1 : i32
    %0 = arith.muli %arg0, %c1_i32 : i32
    %1 = arith.addi %0, %arg1 : i32
    %c0_i32 = arith.constant 0 : i32
    %c0_i32_0 = arith.constant 0 : i32
    return %1, %c0_i32 : i32, i32
  }
  func.func @transform_2(%arg0: i32, %arg1: i32) -> (i32, i32, i32) {
    %c0_i32 = arith.constant 0 : i32
    %c0_i32_0 = arith.constant 0 : i32
    %c0_i32_1 = arith.constant 0 : i32
    return %arg0, %c0_i32, %c0_i32_0 : i32, i32, i32
  }
  func.func @transform_3(%arg0: i32, %arg1: i32) -> (i32, i32, i32) {
    %c0_i32 = arith.constant 0 : i32
    %c0_i32_0 = arith.constant 0 : i32
    %c0_i32_1 = arith.constant 0 : i32
    return %arg0, %c0_i32, %c0_i32_0 : i32, i32, i32
  }
  func.func @transform_4(%arg0: i32, %arg1: i32) -> (i32, i32, i32) {
    %c0_i32 = arith.constant 0 : i32
    %c0_i32_0 = arith.constant 0 : i32
    %c0_i32_1 = arith.constant 0 : i32
    return %arg0, %c0_i32, %c0_i32_0 : i32, i32, i32
  }
}

</mosaic_0001>

<bundles_post_ra>
// kernel: tpu_custom_call.1
= control target key start
LH: loop header
LB: loop body
LE: loop exit
PB: predicated region body
PF: predicated region fallthrough
CT: control target
= control target key end

     0   :  { %s1156_s0 = inlined_call_operand.hbm [shape: f32[32,128], index: 0, kind: input, shape index: {}]   ;;  %s1157_s1 = inlined_call_operand.hbm [shape: f32[32,128], index: 1, kind: input, shape index: {}]   ;;  %s1158_s2 = inlined_call_operand.hbm [shape: f32[2,8,128], index: 2, kind: output, shape index: {0}]   ;;  %s1159_s3 = inlined_call_operand.hbm [shape: f32[2,8,128], index: 3, kind: output, shape index: {1}]   ;;  %s1160_s4 = inlined_call_operand.hbm [shape: f32[2,8,128], index: 4, kind: output, shape index: {2}]  }
   0x1   :  { %1163 = sst [smem:[#allocation17_spill]] %s1156_s0 }
   0x2   :  { %10 = vsyncpa [#allocation3], 0 }
   0x3   :  { %12 = vsyncpa [#allocation3 + $0x1], 0 }
   0x4   :  { %13 = vsyncpa [#allocation6], 0 }
   0x5   :  { %15 = vsyncpa [#allocation6 + $0x1], 0 }
   0x6   :  { %16 = vsyncpa [#allocation4], 0 }
   0x7   :  { %18 = vsyncpa [#allocation4 + $0x1], 0 }
   0x8   :  { %19 = vsyncpa [#allocation9], 0 }
   0x9   :  { %21 = vsyncpa [#allocation9 + $0x1], 0  ;;  %s900_s15 = smov 0   ;;  %s902_s16 = smov 0  }
   0xa   :  { %s904_s17 = smov 0   ;;  %s906_s18 = smov 0  }
   0xb   :  { %s908_s19 = smov 0   ;;  %s910_s20 = smov 0  }
   0xc LB: > { %s931_s21 = sadd.s32 4294967295, %s863_s20   ;;  %s1161_s22 = sadd.s32 4294967294, %s863_s20   ;;  %s863_s20 = sphi %s910_s20, %s27_s20   ;;  %s859_s19 = sphi %s908_s19, %s1180_s19   ;;  %s855_s18 = sphi %s906_s18, %s1179_s18   ;;  %s851_s17 = sphi %s904_s17, %s1178_s17   ;;  %s847_s16 = sphi %s902_s16, %s1177_s16   ;;  %s843_s15 = sphi %s900_s15, %s1176_s15  }
   0xd   : > { %s39_s23 = sadd.s32 1, %s859_s19  ;;  %s48_s24 = sadd.s32 1, %s851_s17 }
   0xe   : > { %p41_p0 = scmp.ge.s32.totalorder %s39_s23, 2  ;;  %p55_p1 = scmp.ne.s32.totalorder %s851_s17, %s847_s16 }
   0xf   : > { %p56_p2 = scmp.eq.s32.totalorder %s863_s20, 0  ;;  %p61_p3 = scmp.ne.s32.totalorder %s847_s16, %s843_s15 }
  0x10   : > { %s1182_s23 = smov (%p41_p0, %s39_s23), 0  ;;  %p62_p5 = scmp.eq.s32.totalorder %s931_s21, 0 }
  0x11   : > { %1164 = sst [smem:[#allocation15_spill]] %s1182_s23  ;;  %p943_p4 = por %p56_p2, %p55_p1 }
  0x12   : > { %s45_s26 = ssub.s32 %s859_s19, %s1182_s23  ;;  %p113_p6 = scmp.eq.s32.totalorder %s931_s21, 1 }
  0x13   : > { %p46_p7 = scmp.eq.s32.totalorder %s45_s26, 0  ;;  %p951_p8 = por %p62_p5, %p61_p3 }
  0x14   : > { %p955_p9 = por %p113_p6, %p55_p1  ;;  %p119_p10 = scmp.eq.s32.totalorder %s1161_s22, 1 }
  0x15   : > { %s962_s29 = scalar_select %p46_p7, %s851_s17, %s48_s24  }
  0x16   : > { %p964_p11 = por %p119_p10, %p61_p3  ;;  %p560_p12 = scmp.ge.s32.totalorder %s863_s20, 2 }
  0x17   : > { %1168 = sst [smem:[#allocation16_spill]] %s962_s29  ;;  %p612_p13 = scmp.lt.s32.totalorder %s863_s20, 2 }
  0x18   : > { %s971_s5 = sand.u32 1, %s851_s17   ;;  %s583_s7 = sshll.u32 %s859_s19, 8 }
  0x19   : > { %s561_s6 = sshll.u32 %s971_s5, 4  ;;  %s1170_s0 = sld [smem:[#allocation17_spill]] }
  0x1a   : > { %s195_s11 = scalar_lea.vmem [#allocation2], %s561_s6  ;;  %p984_p0 = pnand %p612_p13, %p943_p4 }
  0x1b   : > { %s203_s12 = sshll.u32 %s195_s11, 4  ;;  %p567_p1 = scmp.ge.s32.totalorder %s863_s20, 1  ;;  %s204_s12 = int_to_ptr.vmem [resolvable:$true] %s203_s12 }
  0x1c   : > { %s192_s14 = scalar_lea.sflag [#allocation3], %s971_s5  ;;  %p669_p2 = pneg %p984_p0 }
  0x1d   : > { %s680_s24 = scalar_lea.vmem %s204_s12, 256  ;;  %s865_s26 = smov [#allocation2]  }
  0x1e   : > { %p681_p3 = scmp.ne.s32.totalorder %s204_s12, %s680_s24  ;;  %s685_s8 = sshll.u32 %s865_s26, 4  ;;  %s686_s8 = int_to_ptr.vmem [resolvable:$false] %s685_s8 }
  0x1f   : > { %s202_s10 = scalar_lea.hbm %s1170_s0, %s583_s7  ;;  %s687_s25 = scalar_lea.vmem %s686_s8, 512 }
  0x20   : > { %p683_p5 = pnand %p681_p3, %p669_p2  ;;  %p688_p4 = scmp.lt.s32.totalorder %s204_s12, %s686_s8 }
  0x21   : > { %p689_p7 = scmp.lt.s32.totalorder %s687_s25, %s680_s24 }
  0x22   : > { %p684_p6 = pneg %p683_p5 }
  0x23   : > { %p690_p10 = por %p689_p7, %p688_p4 }
  0x25   : > { %p691_p13 = pnand %p690_p10, %p684_p6 }
  0x27   : > { %694 = shalt.err (!%p691_p13)
}
  0x28   : > { %s866_s9 = smov 128   ;;  %s867_s11 = smov 8  }
  0x29   : > { %598 = dma.hbm_to_vmem [thread:$0]  (!%p984_p0), %s202_s10, 256, %s204_s12, %s192_s14, %s866_s9, %s866_s9, %s867_s11  }
  0x2a   : > { %p233_p3 = scmp.lt.s32.totalorder %s863_s20, 3  ;;  %s224_s24 = scalar_lea.hbm %s1157_s1, %s583_s7 }
  0x2b   : > { %s217_s25 = scalar_lea.vmem [#allocation5], %s561_s6  ;;  %s214_s23 = scalar_lea.sflag [#allocation6], %s971_s5 }
  0x2c   : > { %p1005_p5 = pnand %p567_p1, %p233_p3  ;;  %s225_s0 = sshll.u32 %s217_s25, 4  ;;  %s226_s0 = int_to_ptr.vmem [resolvable:$true] %s225_s0 }
  0x2d   : > { %s708_s29 = scalar_lea.vmem %s226_s0, 256  ;;  %s868_s10 = smov [#allocation5]  }
  0x2e   : > { %p709_p6 = scmp.ne.s32.totalorder %s226_s0, %s708_s29  ;;  %s713_s12 = sshll.u32 %s868_s10, 4  ;;  %s714_s12 = int_to_ptr.vmem [resolvable:$false] %s713_s12 }
  0x2f   : > { %s715_s22 = scalar_lea.vmem %s714_s12, 512  ;;  %p716_p10 = scmp.lt.s32.totalorder %s226_s0, %s714_s12 }
  0x30   : > { %p711_p4 = pnand %p709_p6, %p669_p2  ;;  %p717_p1 = scmp.lt.s32.totalorder %s715_s22, %s708_s29 }
  0x32   : > { %p712_p7 = pneg %p711_p4  ;;  %p718_p13 = por %p717_p1, %p716_p10 }
  0x34   : > { %p719_p3 = pnand %p718_p13, %p712_p7 }
  0x36   : > { %722 = shalt.err (!%p719_p3)
}
  0x37   : > { %601 = dma.hbm_to_vmem [thread:$0]  (!%p984_p0), %s224_s24, 256, %s226_s0, %s214_s23, %s866_s9, %s866_s9, %s867_s11  }
  0x38   : > { %237 = sbr.rel (%p1005_p5) target bundleno = 136 (0x88), region = 28  ;;  %s1020_s5 = sand.u32 (!%p1005_p5), 1, %s847_s16  }
  0x39   : > { %s568_s6 = sshll.u32 (!%p1005_p5), %s1020_s5, 4  ;;  %s240_s7 = scalar_lea.sflag (!%p1005_p5), [#allocation3], %s1020_s5 }
  0x3a   : > { %s243_s14 = scalar_lea.vmem (!%p1005_p5), [#allocation2], %s568_s6 }
  0x3d   : > { %826 = dma.done.wait (%p951_p8), %s240_s7, 256  }
  0x3e   : > { %828 = vsyncadd (%p951_p8), %s240_s7, 4294967040  ;;  %s249_s0 = scalar_lea.sflag [#allocation6], %s1020_s5  ;;  %s252_s23 = scalar_lea.vmem [#allocation5], %s568_s6 }
  0x3f   : > { %830 = dma.done.wait (%p951_p8), %s249_s0, 256  }
  0x40   : > { %832 = vsyncadd (%p951_p8), %s249_s0, 4294967040  ;;  %s1034_s29 = sshll.u32 %s1020_s5, 3  ;;  %v303_v0 = vld [vmem:[%s243_s14] sm:$0xff]  ;;  %v304_v1 = vld [vmem:[%s243_s14 + $0x8] sm:$0xff]  ;;  %v869_v8 = vmov 1.0   ;;  %s348_s27 = sand.u32 1, %s931_s21  }
  0x41   : > { %v305_v2 = vld [vmem:[%s252_s23] sm:$0xff]  ;;  %v306_v3 = vld [vmem:[%s252_s23 + $0x8] sm:$0xff]  ;;  %v311_v4 = vmul.f32 10.0, %v303_v0  ;;  %v312_v5 = vmul.f32 10.0, %v304_v1  ;;  %vm307_vm0 = vcmp.lt.f32.partialorder %v303_v0, 0.01 }
  0x42   : > { %vm317_vm1 = vcmp.gt.f32.partialorder %v303_v0, 0.0  ;;  %vm308_vm2 = vcmp.lt.f32.partialorder %v304_v1, 0.01  ;;  %vm318_vm3 = vcmp.gt.f32.partialorder %v304_v1, 0.0  ;;  %vm319_vm4 = vcmp.gt.f32.partialorder %v305_v2, 0.0  ;;  %s291_s13 = scalar_lea.vmem [#allocation10], %s1034_s29 }
  0x43   : > { %v313_v6 = vsub.f32 %v311_v4, %v305_v2  ;;  %v314_v7 = vsub.f32 %v312_v5, %v306_v3  ;;  %vm320_vm5 = vcmp.gt.f32.partialorder %v306_v3, 0.0  ;;  %vm321_vm6 = vmxor %vm317_vm1, %vm319_vm4  ;;  %v309_v9 = vsel %vm307_vm0, 4.0, %v869_v8  ;;  %s393_s9 = sshll.u32 %s291_s13, 4  ;;  %s578_s11 = sshll.u32 %s855_s18, 7  ;;  %s1040_s9 = int_to_ptr.vmem [resolvable:$true] %s393_s9 }
  0x44   : > { %v310_v10 = vsel %vm308_vm2, 4.0, %v869_v8  ;;  %vm322_vm7 = vmxor %vm318_vm3, %vm320_vm5  ;;  %vm870_vm8 = vmmov 1   ;;  %v871_v13 = vmov 0.0   ;;  %s284_s26 = scalar_lea.vmem [#allocation8], %s1034_s29  ;;  %s277_s21 = scalar_lea.vmem [#allocation7], %s1034_s29 }
  0x45   : > { %v315_v11 = vand.u32 2147483647, %v313_v6  ;;  %v316_v12 = vand.u32 2147483647, %v314_v7  ;;  %vm323_vm9 = vmxor %vm321_vm6, %vm870_vm8  ;;  %s380_s24 = sshll.u32 %s284_s26, 4  ;;  %s367_s8 = sshll.u32 %s277_s21, 4  ;;  %s1050_s24 = int_to_ptr.vmem [resolvable:$true] %s380_s24  ;;  %s1062_s8 = int_to_ptr.vmem [resolvable:$true] %s367_s8 }
  0x46   : > { %vm324_vm10 = vmxor %vm322_vm7, %vm870_vm8  ;;  %v573_v14 = vsel %vm323_vm9, 1.0, %v871_v13  ;;  %s1048_s12 = scalar_lea.hbm %s1159_s3, %s578_s11  ;;  %s1055_s6 = scalar_lea.hbm %s1160_s4, %s578_s11 }
  0x47   : > { %v336_v15 = vadd.f32 %v316_v12, %v315_v11  ;;  %v330_v16 = vmul.f32 %v315_v11, %v309_v9  ;;  %v331_v17 = vmul.f32 %v316_v12, %v310_v10  ;;  %v574_v18 = vsel %vm324_vm10, 1.0, %v871_v13  ;;  %s1060_s0 = scalar_lea.hbm %s1158_s2, %s578_s11  ;;  %s1064_s23 = scalar_lea.sflag [#allocation9], %s348_s27 }
  0x48   : > { %v340_v19 = vadd.f32 %v574_v18, %v573_v14  ;;  %s723_s25 = scalar_lea.vmem %s1050_s24, 128  ;;  %s872_s10 = smov [#allocation8]  }
  0x49   : > { %v332_v20 = vadd.f32 %v331_v17, %v330_v16  ;;  %338 = vst [vmem:[%s284_s26] sm:$0xff] %v336_v15  ;;  %p724_p8 = scmp.ne.s32.totalorder %s1050_s24, %s723_s25  ;;  %s727_s18 = sshll.u32 %s872_s10, 4  ;;  %s728_s18 = int_to_ptr.vmem [resolvable:$false] %s727_s18 }
  0x4a   : > { %342 = vst [vmem:[%s291_s13] sm:$0xff] %v340_v19  ;;  %s729_s22 = scalar_lea.vmem %s728_s18, 256  ;;  %p730_p5 = scmp.lt.s32.totalorder %s1050_s24, %s728_s18 }
  0x4b   : > { %p725_p0 = pnand %p724_p8, %p955_p9  ;;  %p731_p6 = scmp.lt.s32.totalorder %s729_s22, %s723_s25 }
  0x4d   : > { %p726_p2 = pneg %p725_p0  ;;  %p732_p4 = por %p731_p6, %p730_p5 }
  0x4f   : > { %p733_p7 = pnand %p732_p4, %p726_p2 }
  0x51   : > { %736 = shalt.err (!%p733_p7)
}
  0x52   : > { %s737_s27 = scalar_lea.hbm %s1048_s12, 128  ;;  %s741_s26 = scalar_lea.hbm %s1159_s3, 256 }
  0x53   : > { %p738_p10 = scmp.ne.s32.totalorder %s1048_s12, %s737_s27  ;;  %p742_p3 = scmp.lt.s32.totalorder %s1048_s12, %s1159_s3 }
  0x54   : > { %p743_p8 = scmp.lt.s32.totalorder %s741_s26, %s737_s27 }
  0x55   : > { %p739_p1 = pnand %p738_p10, %p955_p9 }
  0x56   : > { %p744_p0 = por %p743_p8, %p742_p3 }
  0x57   : > { %p740_p13 = pneg %p739_p1 }
  0x59   : > { %p745_p2 = pnand %p744_p0, %p740_p13 }
  0x5b   : > { %748 = shalt.err (!%p745_p2)
}
  0x5c   : > { %590 = dma.vmem_to_hbm [thread:$0]  (%p955_p9), %s1050_s24, 128, %s1048_s12, %s1064_s23   ;;  %334 = vst [vmem:[%s277_s21] sm:$0xff] %v332_v20 }
  0x5d   : > { %s749_s25 = scalar_lea.vmem %s1040_s9, 128  ;;  %s873_s10 = smov [#allocation10]  }
  0x5e   : > { %p750_p5 = scmp.ne.s32.totalorder %s1040_s9, %s749_s25  ;;  %s753_s18 = sshll.u32 %s873_s10, 4  ;;  %s754_s18 = int_to_ptr.vmem [resolvable:$false] %s753_s18 }
  0x5f   : > { %s755_s22 = scalar_lea.vmem %s754_s18, 256  ;;  %p756_p7 = scmp.lt.s32.totalorder %s1040_s9, %s754_s18 }
  0x60   : > { %p751_p6 = pnand %p750_p5, %p955_p9  ;;  %p757_p10 = scmp.lt.s32.totalorder %s755_s22, %s749_s25 }
  0x62   : > { %p752_p4 = pneg %p751_p6  ;;  %p758_p1 = por %p757_p10, %p756_p7 }
  0x64   : > { %p759_p13 = pnand %p758_p1, %p752_p4 }
  0x66   : > { %762 = shalt.err (!%p759_p13)
}
  0x67   : > { %s763_s29 = scalar_lea.hbm %s1055_s6, 128  ;;  %s767_s12 = scalar_lea.hbm %s1160_s4, 256 }
  0x68   : > { %p764_p3 = scmp.ne.s32.totalorder %s1055_s6, %s763_s29  ;;  %p768_p2 = scmp.lt.s32.totalorder %s1055_s6, %s1160_s4 }
  0x69   : > { %p769_p5 = scmp.lt.s32.totalorder %s767_s12, %s763_s29 }
  0x6a   : > { %p765_p8 = pnand %p764_p3, %p955_p9 }
  0x6b   : > { %p770_p6 = por %p769_p5, %p768_p2 }
  0x6c   : > { %p766_p0 = pneg %p765_p8 }
  0x6e   : > { %p771_p4 = pnand %p770_p6, %p766_p0 }
  0x70   : > { %774 = shalt.err (!%p771_p4)
}
  0x71   : > { %591 = dma.vmem_to_hbm [thread:$0]  (%p955_p9), %s1040_s9, 128, %s1055_s6, %s1064_s23  }
  0x72   : > { %s344_s11 = scalar_lea.sflag [#allocation4], %s1020_s5  ;;  %s775_s26 = scalar_lea.vmem %s1062_s8, 128 }
  0x73   : > { %p776_p7 = scmp.ne.s32.totalorder %s1062_s8, %s775_s26  ;;  %s874_s7 = smov [#allocation7]  }
  0x74   : > { %s779_s14 = sshll.u32 %s874_s7, 4  ;;  %s780_s14 = int_to_ptr.vmem [resolvable:$false] %s779_s14 }
  0x75   : > { %p777_p10 = pnand %p776_p7, %p955_p9  ;;  %s781_s25 = scalar_lea.vmem %s780_s14, 256 }
  0x76   : > { %p782_p13 = scmp.lt.s32.totalorder %s1062_s8, %s780_s14  ;;  %p783_p3 = scmp.lt.s32.totalorder %s781_s25, %s775_s26 }
  0x77   : > { %p778_p1 = pneg %p777_p10 }
  0x78   : > { %p784_p8 = por %p783_p3, %p782_p13 }
  0x7a   : > { %p785_p0 = pnand %p784_p8, %p778_p1 }
  0x7c   : > { %788 = shalt.err (!%p785_p0)
}
  0x7d   : > { %s789_s9 = scalar_lea.hbm %s1060_s0, 128  ;;  %s793_s23 = scalar_lea.hbm %s1158_s2, 256 }
  0x7e   : > { %p790_p2 = scmp.ne.s32.totalorder %s1060_s0, %s789_s9  ;;  %p794_p4 = scmp.lt.s32.totalorder %s1060_s0, %s1158_s2 }
  0x7f   : > { %p795_p7 = scmp.lt.s32.totalorder %s793_s23, %s789_s9 }
  0x80   : > { %p791_p5 = pnand %p790_p2, %p955_p9 }
  0x81   : > { %p796_p10 = por %p795_p7, %p794_p4 }
  0x82   : > { %p792_p6 = pneg %p791_p5 }
  0x84   : > { %p797_p1 = pnand %p796_p10, %p792_p6 }
  0x86   : > { %800 = shalt.err (!%p797_p1)
}
  0x87   : > { %589 = dma.vmem_to_hbm [thread:$0]  (%p955_p9), %s1062_s8, 128, %s1060_s0, %s344_s11  }
  0x88 PF: > { %s405_s22 = sand.u32 1, %s843_s15   ;;  %p603_p13 = pnand %p560_p12, %p964_p11 }
  0x89   : > { %s406_s29 = scalar_lea.sflag [#allocation4], %s405_s22 }
  0x8a   : > { %p604_p3 = pneg %p603_p13 }
  0x8c   : > { %834 = dma.done.wait (%p604_p3), %s406_s29, 128  }
  0x8d   : > { %836 = vsyncadd (%p604_p3), %s406_s29, 4294967168  ;;  %s1173_s24 = sadd.s32 4294967294, %s863_s20  }
  0x8e   : > { %s414_s21 = sand.u32 1, %s1173_s24  }
  0x8f   : > { %s415_s12 = scalar_lea.sflag [#allocation9], %s414_s21 }
  0x90   : > { %838 = dma.done.wait (%p604_p3), %s415_s12, 256  }
  0x91   : > { %840 = vsyncadd (%p604_p3), %s415_s12, 4294967040  ;;  %s27_s20 = sadd.s32 1, %s863_s20   ;;  %s1174_s28 = sld [smem:[#allocation16_spill]] }
  0x92   : > { %p24_p9 = scmp.ge.s32.totalorder %s27_s20, 4   ;;  %s1175_s30 = sld [smem:[#allocation15_spill]] }
  0x93   : > { %s1176_s15 = smov %s847_s16  ;;  %s1177_s16 = smov %s851_s17 }
  0x94   : > { %s1179_s18 = smov %s859_s19  ;;  %26 = sbr.rel (!%p24_p9) target bundleno = 12 (0xc), region = 122 }
  0x97   : > { %s1178_s17 = smov %s1174_s28 }
  0x98   : > { %s1180_s19 = smov %s1175_s30 }
  0x99   :  { %429 = vsyncpa [#allocation3], 1 }
  0x9a   :  { %431 = vsyncpa [#allocation3 + $0x1], 1 }
  0x9b   :  { %432 = vsyncpa [#allocation6], 1 }
  0x9c   :  { %434 = vsyncpa [#allocation6 + $0x1], 1 }
  0x9d   :  { %435 = vsyncpa [#allocation4], 1 }
  0x9e   :  { %437 = vsyncpa [#allocation4 + $0x1], 1 }
  0x9f   :  { %438 = vsyncpa [#allocation9], 1 }
  0xa0   :  { %440 = vsyncpa [#allocation9 + $0x1], 1 }

</bundles_post_ra>
